<compile_context>
chip_gen: v7x
topology: tpu7x:2x2x1
jax: 0.10.0
libtpu: 0.0.40
codegen_flags: <defaults>
</compile_context>

<pallas_src>
import jax
import jax.numpy as jnp
from jax.experimental import pallas as pl
from jax.experimental.pallas import tpu as pltpu


# ---------------------------------------------------------------------------
# Pallas kernel 1: separable Sobel edge magnitude + |cos(theta)| (getEdge()).
# ---------------------------------------------------------------------------
def _edge_kernel(x_ref, e_ref, c_ref):
    x = x_ref[0]                      # (H, W) float32
    H, W = x.shape

    def sh(v, dr, dc):
        # y[i, j] = v[i + dr, j + dc] with wrap-around; wrapped values only
        # ever land on the border, which is zeroed below.
        if dr:
            v = pltpu.roll(v, shift=(-dr) % H, axis=0)
        if dc:
            v = pltpu.roll(v, shift=(-dc) % W, axis=1)
        return v

    # Separable Sobel (cross-correlation, matching F.conv2d):
    #   gx = [1,2,1]^T (rows) x [-1,0,1] (cols)   -> [[-1,0,1],[-2,0,2],[-1,0,1]]
    #   gy = [1,0,-1]^T (rows) x [1,2,1]  (cols)  -> [[1,2,1],[0,0,0],[-1,-2,-1]]
    sy = sh(x, -1, 0) + 2.0 * x + sh(x, 1, 0)     # vertical [1,2,1]
    sx = sh(x, 0, -1) + 2.0 * x + sh(x, 0, 1)     # horizontal [1,2,1]
    gx = sh(sy, 0, 1) - sh(sy, 0, -1)
    gy = sh(sx, -1, 0) - sh(sx, 1, 0)

    # valid conv + zero border == F.pad(..., (1,1,1,1), 0); also masks the
    # roll wrap-around (correct because the block covers the full plane).
    ri = jax.lax.broadcasted_iota(jnp.int32, (H, W), 0)
    ci = jax.lax.broadcasted_iota(jnp.int32, (H, W), 1)
    interior = (ri >= 1) & (ri <= H - 2) & (ci >= 1) & (ci <= W - 2)
    gx = jnp.where(interior, gx, 0.0)
    gy = jnp.where(interior, gy, 0.0)

    edge = jnp.sqrt(gx * gx + gy * gy)
    # |cos(atan2(gy, gx))| == |gx| / edge ; atan2(0, 0) == 0 -> cos == 1.
    safe = jnp.where(edge > 0.0, edge, 1.0)
    e_ref[0] = edge
    c_ref[0] = jnp.where(edge > 0.0, jnp.abs(gx) / safe, 1.0)


def get_edge(images_1ch):
    """images_1ch: (N, H, W) -> (edges, abs_cos_theta), each (N, H, W) float32.

    Mirrors EdgeguidedNormalLoss.getEdge: valid 3x3 Sobel conv + zero padding.
    Instead of the (unused-beyond-|cos|/|sin|) theta plane, the kernel emits
    |cos(theta)| directly; |sin(theta)| is recovered as sqrt(1 - cos^2).
    """
    N, H, W = images_1ch.shape
    # TODO(synk): for very large planes (H*W f32 * ~6 buffers > scoped VMEM)
    # this should be row-tiled with a 1-row halo instead of whole-plane blocks.
    edges, abscos = pl.pallas_call(
        _edge_kernel,
        grid=(N,),
        in_specs=[pl.BlockSpec((1, H, W), lambda i: (i, 0, 0))],
        out_specs=[pl.BlockSpec((1, H, W), lambda i: (i, 0, 0))] * 2,
        out_shape=[jax.ShapeDtypeStruct((N, H, W), jnp.float32)] * 2,
        compiler_params=pltpu.CompilerParams(dimension_semantics=("parallel",)),
    )(images_1ch.astype(jnp.float32))
    return edges, abscos


# ---------------------------------------------------------------------------
# Pallas kernel 2: batched, L-tiled pairwise cosine-consistency reduction.
# ---------------------------------------------------------------------------
def _pair_loss_kernel(a_ref, b_ref, m_ref, out_ref, acc_ref):
    k = pl.program_id(1)

    @pl.when(k == 0)
    def _init():
        acc_ref[0] = jnp.float32(0.0)
        acc_ref[1] = jnp.float32(0.0)

    C = a_ref.shape[1]
    m = m_ref[0]                                        # (1, TILE) float mask
    # Channel dot product as an explicit FMA over rows (pure VPU, no sublane
    # reduce over a 3/8-occupied vreg).
    cos = a_ref[0, 0:1, :] * b_ref[0, 0:1, :]
    for ch in range(1, C):
        cos = cos + a_ref[0, ch:ch + 1, :] * b_ref[0, ch:ch + 1, :]
    # NOTE: the reference also computes target_cos = sum(targets_A*targets_B)
    # but never uses it in the returned loss, so it is omitted.
    acc_ref[0] += jnp.sum(jnp.abs(1.0 - cos) * m)       # losses_i (partial)
    acc_ref[1] += jnp.sum(m)                            # valid_samples_i (partial)

    @pl.when(k == pl.num_programs(1) - 1)
    def _finalize():
        rows = jax.lax.broadcasted_iota(jnp.int32, (8, 128), 0)
        out_ref[0] = jnp.where(rows == 0, acc_ref[0],
                               jnp.where(rows == 1, acc_ref[1], 0.0))


def _round_up(x, m):
    return ((x + m - 1) // m) * m


_MAX_TILE_L = 32768   # lanes per grid step; ~0.9 MiB/step of operand VMEM


def _pair_loss(inputs_A, inputs_B, consistency):
    """inputs_A/B: (n, C, L), consistency: (n, L) -> (sum losses, sum valid)."""
    n, C, L = inputs_A.shape
    L_pad = _round_up(L, 128)
    tile = min(_MAX_TILE_L, L_pad)
    L_pad = _round_up(L_pad, tile)

    A = inputs_A.astype(jnp.float32)
    B = inputs_B.astype(jnp.float32)
    M = consistency.astype(jnp.float32)
    pad = L_pad - L
    if pad:
        A = jnp.pad(A, ((0, 0), (0, 0), (0, pad)))
        B = jnp.pad(B, ((0, 0), (0, 0), (0, pad)))
        M = jnp.pad(M, ((0, 0), (0, pad)))      # zero mask -> padding contributes 0
    M = M.reshape(n, 1, L_pad)

    out = pl.pallas_call(
        _pair_loss_kernel,
        grid=(n, L_pad // tile),
        in_specs=[
            pl.BlockSpec((1, C, tile), lambda i, k: (i, 0, k)),
            pl.BlockSpec((1, C, tile), lambda i, k: (i, 0, k)),
            pl.BlockSpec((1, 1, tile), lambda i, k: (i, 0, k)),
        ],
        out_specs=pl.BlockSpec((1, 8, 128), lambda i, k: (i, 0, 0)),
        out_shape=jax.ShapeDtypeStruct((n, 8, 128), jnp.float32),
        scratch_shapes=[pltpu.SMEM((2,), jnp.float32)],
        compiler_params=pltpu.CompilerParams(
            dimension_semantics=("parallel", "arbitrary")),
    )(A, B, M)
    return jnp.sum(out[:, 0, 0]), jnp.sum(out[:, 1, 0])


# ---------------------------------------------------------------------------
# edgeGuidedSampling (JAX glue; shape-static version of the dynamic torch code)
# ---------------------------------------------------------------------------
def _edge_guided_sampling(key, preds_flat, edges_flat, abscos_flat,
                          masks_flat, h, w):
    HW = h * w
    edges_max = jnp.max(edges_flat)
    edges_mask = edges_flat >= edges_max * 0.1
    minlen = jnp.sum(edges_mask.astype(jnp.int32))      # == sample_num (dynamic)

    # Stable sort puts edge-pixel flat indices first, in ascending order,
    # matching torch.nonzero / masked_select ordering.
    edges_loc = jnp.argsort(jnp.logical_not(edges_mask), stable=True)
    abscos_edge = abscos_flat[edges_loc]

    k_anchor, k_dist = jax.random.split(key)
    S = HW                    # static upper bound; samples >= minlen masked out
    u = jax.random.uniform(k_anchor, (S,), dtype=jnp.float32)
    index_anchors = jnp.clip((u * minlen).astype(jnp.int32),
                             0, jnp.maximum(minlen - 1, 0))
    abscos_anchors = abscos_edge[index_anchors]         # |cos(theta_anchors)|
    abssin_anchors = jnp.sqrt(jnp.maximum(1.0 - abscos_anchors * abscos_anchors,
                                          0.0))         # |sin(theta_anchors)|
    anchor_loc = edges_loc[index_anchors]
    row_anchors = anchor_loc // w                       # ind2sub(idx, w)
    col_anchors = anchor_loc - row_anchors * w

    distance = jax.random.randint(k_dist, (4, S), 3, 20).astype(jnp.float32)
    pos_or_neg = jnp.array([[-1.0], [-1.0], [1.0], [1.0]], jnp.float32)
    distance = distance * pos_or_neg

    col = col_anchors[None, :] + jnp.round(
        distance * abscos_anchors[None, :]).astype(jnp.int32)
    row = row_anchors[None, :] + jnp.round(
        distance * abssin_anchors[None, :]).astype(jnp.int32)
    col = jnp.clip(col, 0, w - 1)
    row = jnp.clip(row, 0, h - 1)

    a = row[0] * w + col[0]                             # sub2ind
    b = row[1] * w + col[1]
    c = row[2] * w + col[2]
    d = row[3] * w + col[3]
    A = jnp.concatenate([a, b, c], axis=0)              # (3S,)
    B = jnp.concatenate([b, c, d], axis=0)

    inputs_A = jnp.take(preds_flat, A, axis=1)          # (C, 3S)
    inputs_B = jnp.take(preds_flat, B, axis=1)
    masks_A = masks_flat[A]
    masks_B = masks_flat[B]
    # Only the first `minlen` (== sample_num) samples of each third are real.
    sample_valid = jnp.tile(jnp.arange(S) < minlen, 3)
    consistency = (masks_A & masks_B & sample_valid).astype(jnp.float32)
    return inputs_A, inputs_B, consistency


# ---------------------------------------------------------------------------
# Module
# ---------------------------------------------------------------------------
class EdgeguidedNormalLoss:
    def __init__(self, point_pairs=10000, cos_theta1=0.25, cos_theta2=0.98,
                 cos_theta3=0.5, cos_theta4=0.86, mask_value=1e-8,
                 loss_weight=1.0, **kwargs):
        self.point_pairs = point_pairs
        self.mask_value = mask_value
        self.cos_theta1 = cos_theta1   # dead params in the reference loss too
        self.cos_theta2 = cos_theta2
        self.cos_theta3 = cos_theta3
        self.cos_theta4 = cos_theta4
        self.loss_weight = loss_weight
        self.eps = 1e-6

    def __call__(self, prediction, target, mask, input, intrinsic, *,
                 predictions_normals, targets_normals, targets_normals_masks,
                 sampling_key):
        return self.get_loss(prediction, target, mask, input, intrinsic,
                             predictions_normals, targets_normals,
                             targets_normals_masks, sampling_key)

    def get_loss(self, prediction, target, mask, input, intrinsic,
                 predictions_normals, targets_normals, targets_normals_masks,
                 sampling_key):
        # TODO(synk): Depth2Normal is an external module not defined in the
        # reference file; this implementation uses the kwargs path of get_loss
        # (normals and their masks are provided directly).
        masks_normals = mask & targets_normals_masks       # (n,1,h,w) bool

        # getEdge on RGB: c == 3 -> only channel 0 is convolved.
        edges_img, abscos_img = get_edge(input[:, 0, :, :])
        # NOTE: the reference also calls getEdge(gt_depths) but never uses the
        # result, so that pass is dropped entirely (perf).

        n, c, h, w = targets_normals.shape
        preds = predictions_normals.reshape(n, c, h * w).astype(jnp.float32)
        masks_flat = masks_normals.reshape(n, h * w)
        edges_img = edges_img.reshape(n, h * w)
        abscos_img = abscos_img.reshape(n, h * w)

        keys = jax.random.split(sampling_key, n)
        inputs_A, inputs_B, consistency = jax.vmap(
            lambda k_, p_, e_, a_, m_: _edge_guided_sampling(k_, p_, e_, a_,
                                                             m_, h, w)
        )(keys, preds, edges_img, abscos_img, masks_flat)

        losses, valid_samples = _pair_loss(inputs_A, inputs_B, consistency)

        loss = losses / (valid_samples + self.eps) * self.loss_weight
        bad = jnp.isnan(loss) | jnp.isinf(loss)
        loss = jnp.where(bad, 0.0 * jnp.sum(prediction), loss)
        return loss


# ---------------------------------------------------------------------------
if __name__ == "__main__":
    key = jax.random.PRNGKey(0)
    N, H, W = 2, 16, 16
    ks = jax.random.split(key, 8)

    prediction = jax.random.uniform(ks[0], (N, 1, H, W), jnp.float32, 0.5, 10.0)
    target = jax.random.uniform(ks[1], (N, 1, H, W), jnp.float32, 0.5, 10.0)
    mask = jax.random.uniform(ks[2], (N, 1, H, W)) > 0.2
    rgb = jax.random.uniform(ks[3], (N, 3, H, W), jnp.float32, 0.0, 255.0)
    intrinsic = jnp.tile(jnp.eye(3, dtype=jnp.float32)[None], (N, 1, 1))

    def unit_normals(k):
        v = jax.random.normal(k, (N, 3, H, W), jnp.float32)
        return v / (jnp.linalg.norm(v, axis=1, keepdims=True) + 1e-8)

    predictions_normals = unit_normals(ks[4])
    targets_normals = unit_normals(ks[5])
    targets_normals_masks = jax.random.uniform(ks[6], (N, 1, H, W)) > 0.1

    loss_mod = EdgeguidedNormalLoss(loss_weight=1.0)

    @jax.jit
    def run(prediction, target, mask, rgb, intrinsic, pn, tn, tnm, skey):
        return loss_mod(prediction, target, mask, rgb, intrinsic,
                        predictions_normals=pn, targets_normals=tn,
                        targets_normals_masks=tnm, sampling_key=skey)

    loss = run(prediction, target, mask, rgb, intrinsic,
               predictions_normals, targets_normals, targets_normals_masks,
               ks[7])
    jax.block_until_ready(loss)
    assert loss.shape == ()
    print("KERNEL_OK")
</pallas_src>

<mosaic_0001>
module attributes {stable_mosaic.version = 11 : i64} {
  func.func @_edge_kernel(%arg0: i32, %arg1: memref<1x16x16xf32, #tpu.memory_space<vmem>>, %arg2: memref<1x16x16xf32, #tpu.memory_space<vmem>>, %arg3: memref<1x16x16xf32, #tpu.memory_space<vmem>>) attributes {dimension_semantics = [#tpu.dimension_semantics<parallel>], iteration_bounds = array<i64: 2>, scalar_prefetch = 0 : i64, scratch_operands = 0 : i64, tpu.core_type = #tpu.core_type<tc>, window_params = [{transform_indices = @transform_0, window_bounds = array<i64: 1, 16, 16>}, {transform_indices = @transform_1, window_bounds = array<i64: 1, 16, 16>}, {transform_indices = @transform_2, window_bounds = array<i64: 1, 16, 16>}]} {
    %c0 = arith.constant 0 : index
    %c0_0 = arith.constant 0 : index
    %c0_1 = arith.constant 0 : index
    %0 = vector.load %arg1[%c0, %c0_0, %c0_1] : memref<1x16x16xf32, #tpu.memory_space<vmem>>, vector<1x16x16xf32>
    %1 = vector.shape_cast %0 : vector<1x16x16xf32> to vector<16x16xf32>
    %c1_i32 = arith.constant 1 : i32
    %2 = tpu.dynamic_rotate %1 by %c1_i32 dim 0 : vector<16x16xf32>, i32 -> vector<16x16xf32>
    %cst = arith.constant 2.000000e+00 : f32
    %3 = vector.broadcast %cst : f32 to vector<16x16xf32>
    %4 = arith.mulf %3, %1 : vector<16x16xf32>
    %5 = arith.addf %2, %4 : vector<16x16xf32>
    %c15_i32 = arith.constant 15 : i32
    %6 = tpu.dynamic_rotate %1 by %c15_i32 dim 0 : vector<16x16xf32>, i32 -> vector<16x16xf32>
    %7 = arith.addf %5, %6 : vector<16x16xf32>
    %c1_i32_2 = arith.constant 1 : i32
    %8 = tpu.dynamic_rotate %1 by %c1_i32_2 dim 1 : vector<16x16xf32>, i32 -> vector<16x16xf32>
    %cst_3 = arith.constant 2.000000e+00 : f32
    %9 = vector.broadcast %cst_3 : f32 to vector<16x16xf32>
    %10 = arith.mulf %9, %1 : vector<16x16xf32>
    %11 = arith.addf %8, %10 : vector<16x16xf32>
    %c15_i32_4 = arith.constant 15 : i32
    %12 = tpu.dynamic_rotate %1 by %c15_i32_4 dim 1 : vector<16x16xf32>, i32 -> vector<16x16xf32>
    %13 = arith.addf %11, %12 : vector<16x16xf32>
    %c15_i32_5 = arith.constant 15 : i32
    %14 = tpu.dynamic_rotate %7 by %c15_i32_5 dim 1 : vector<16x16xf32>, i32 -> vector<16x16xf32>
    %c1_i32_6 = arith.constant 1 : i32
    %15 = tpu.dynamic_rotate %7 by %c1_i32_6 dim 1 : vector<16x16xf32>, i32 -> vector<16x16xf32>
    %16 = arith.subf %14, %15 : vector<16x16xf32>
    %c1_i32_7 = arith.constant 1 : i32
    %17 = tpu.dynamic_rotate %13 by %c1_i32_7 dim 0 : vector<16x16xf32>, i32 -> vector<16x16xf32>
    %c15_i32_8 = arith.constant 15 : i32
    %18 = tpu.dynamic_rotate %13 by %c15_i32_8 dim 0 : vector<16x16xf32>, i32 -> vector<16x16xf32>
    %19 = arith.subf %17, %18 : vector<16x16xf32>
    %20 = tpu.iota {dimensions = array<i32: 0>} : vector<16x16xi32>
    %21 = tpu.iota {dimensions = array<i32: 1>} : vector<16x16xi32>
    %c1_i32_9 = arith.constant 1 : i32
    %22 = vector.broadcast %c1_i32_9 : i32 to vector<16x16xi32>
    %23 = arith.cmpi sge, %20, %22 : vector<16x16xi32>
    %c14_i32 = arith.constant 14 : i32
    %24 = vector.broadcast %c14_i32 : i32 to vector<16x16xi32>
    %25 = arith.cmpi sle, %20, %24 : vector<16x16xi32>
    %26 = arith.andi %23, %25 : vector<16x16xi1>
    %c1_i32_10 = arith.constant 1 : i32
    %27 = vector.broadcast %c1_i32_10 : i32 to vector<16x16xi32>
    %28 = arith.cmpi sge, %21, %27 : vector<16x16xi32>
    %29 = arith.andi %26, %28 : vector<16x16xi1>
    %c14_i32_11 = arith.constant 14 : i32
    %30 = vector.broadcast %c14_i32_11 : i32 to vector<16x16xi32>
    %31 = arith.cmpi sle, %21, %30 : vector<16x16xi32>
    %32 = arith.andi %29, %31 : vector<16x16xi1>
    %cst_12 = arith.constant 0.000000e+00 : f32
    %33 = vector.broadcast %cst_12 : f32 to vector<16x16xf32>
    %34 = arith.select %32, %16, %33 : vector<16x16xi1>, vector<16x16xf32>
    %cst_13 = arith.constant 0.000000e+00 : f32
    %35 = vector.broadcast %cst_13 : f32 to vector<16x16xf32>
    %36 = arith.select %32, %19, %35 : vector<16x16xi1>, vector<16x16xf32>
    %37 = arith.mulf %34, %34 : vector<16x16xf32>
    %38 = arith.mulf %36, %36 : vector<16x16xf32>
    %39 = arith.addf %37, %38 : vector<16x16xf32>
    %40 = math.sqrt %39 : vector<16x16xf32>
    %cst_14 = arith.constant 0.000000e+00 : f32
    %41 = vector.broadcast %cst_14 : f32 to vector<16x16xf32>
    %42 = arith.cmpf ogt, %40, %41 : vector<16x16xf32>
    %cst_15 = arith.constant 1.000000e+00 : f32
    %43 = vector.broadcast %cst_15 : f32 to vector<16x16xf32>
    %44 = arith.select %42, %40, %43 : vector<16x16xi1>, vector<16x16xf32>
    %c0_16 = arith.constant 0 : index
    %c0_17 = arith.constant 0 : index
    %c0_18 = arith.constant 0 : index
    %45 = vector.load %arg2[%c0_16, %c0_17, %c0_18] : memref<1x16x16xf32, #tpu.memory_space<vmem>>, vector<1x16x16xf32>
    %46 = vector.shape_cast %45 : vector<1x16x16xf32> to vector<16x16xf32>
    %47 = vector.shape_cast %40 : vector<16x16xf32> to vector<1x16x16xf32>
    tpu.vector_store %arg2[%c0_16, %c0_17, %c0_18], %47 {strides = array<i32>} : memref<1x16x16xf32, #tpu.memory_space<vmem>>, vector<1x16x16xf32>,
    %cst_19 = arith.constant 0.000000e+00 : f32
    %48 = vector.broadcast %cst_19 : f32 to vector<16x16xf32>
    %49 = arith.cmpf ogt, %40, %48 : vector<16x16xf32>
    %50 = math.absf %34 : vector<16x16xf32>
    %51 = arith.divf %50, %44 : vector<16x16xf32>
    %cst_20 = arith.constant 1.000000e+00 : f32
    %52 = vector.broadcast %cst_20 : f32 to vector<16x16xf32>
    %53 = arith.select %49, %51, %52 : vector<16x16xi1>, vector<16x16xf32>
    %c0_21 = arith.constant 0 : index
    %c0_22 = arith.constant 0 : index
    %c0_23 = arith.constant 0 : index
    %54 = vector.load %arg3[%c0_21, %c0_22, %c0_23] : memref<1x16x16xf32, #tpu.memory_space<vmem>>, vector<1x16x16xf32>
    %55 = vector.shape_cast %54 : vector<1x16x16xf32> to vector<16x16xf32>
    %56 = vector.shape_cast %53 : vector<16x16xf32> to vector<1x16x16xf32>
    tpu.vector_store %arg3[%c0_21, %c0_22, %c0_23], %56 {strides = array<i32>} : memref<1x16x16xf32, #tpu.memory_space<vmem>>, vector<1x16x16xf32>,
    return
  }
  func.func @transform_0(%arg0: i32) -> (i32, i32, i32) {
    %c0_i32 = arith.constant 0 : i32
    %c0_i32_0 = arith.constant 0 : i32
    %c0_i32_1 = arith.constant 0 : i32
    return %arg0, %c0_i32, %c0_i32_0 : i32, i32, i32
  }
  func.func @transform_1(%arg0: i32) -> (i32, i32, i32) {
    %c0_i32 = arith.constant 0 : i32
    %c0_i32_0 = arith.constant 0 : i32
    %c0_i32_1 = arith.constant 0 : i32
    return %arg0, %c0_i32, %c0_i32_0 : i32, i32, i32
  }
  func.func @transform_2(%arg0: i32) -> (i32, i32, i32) {
    %c0_i32 = arith.constant 0 : i32
    %c0_i32_0 = arith.constant 0 : i32
    %c0_i32_1 = arith.constant 0 : i32
    return %arg0, %c0_i32, %c0_i32_0 : i32, i32, i32
  }
}

module attributes {stable_mosaic.version = 11 : i64} {
  func.func @_pair_loss_kernel(%arg0: i32, %arg1: i32, %arg2: memref<1x3x768xf32, #tpu.memory_space<vmem>>, %arg3: memref<1x3x768xf32, #tpu.memory_space<vmem>>, %arg4: memref<1x1x768xf32, #tpu.memory_space<vmem>>, %arg5: memref<1x8x128xf32, #tpu.memory_space<vmem>>, %arg6: memref<2xf32, #tpu.memory_space<smem>>) attributes {dimension_semantics = [#tpu.dimension_semantics<parallel>, #tpu.dimension_semantics<arbitrary>], iteration_bounds = array<i64: 2, 1>, scalar_prefetch = 0 : i64, scratch_operands = 1 : i64, tpu.core_type = #tpu.core_type<tc>, window_params = [{transform_indices = @transform_0, window_bounds = array<i64: 1, 3, 768>}, {transform_indices = @transform_1, window_bounds = array<i64: 1, 3, 768>}, {transform_indices = @transform_2, window_bounds = array<i64: 1, 1, 768>}, {transform_indices = @transform_3, window_bounds = array<i64: 1, 8, 128>}]} {
    %c0_i32 = arith.constant 0 : i32
    %0 = arith.cmpi eq, %arg1, %c0_i32 : i32
    %1 = arith.extui %0 : i1 to i32
    %c0_i32_0 = arith.constant 0 : i32
    %2 = arith.cmpi ne, %1, %c0_i32_0 : i32
    scf.if %2 {
      %cst_27 = arith.constant 0.000000e+00 : f32
      %c0_28 = arith.constant 0 : index
      %43 = memref.load %arg6[%c0_28] : memref<2xf32, #tpu.memory_space<smem>>
      memref.store %cst_27, %arg6[%c0_28] : memref<2xf32, #tpu.memory_space<smem>>
      %cst_29 = arith.constant 0.000000e+00 : f32
      %c1_30 = arith.constant 1 : index
      %44 = memref.load %arg6[%c1_30] : memref<2xf32, #tpu.memory_space<smem>>
      memref.store %cst_29, %arg6[%c1_30] : memref<2xf32, #tpu.memory_space<smem>>
    } else {
    }
    %c0 = arith.constant 0 : index
    %c0_1 = arith.constant 0 : index
    %c0_2 = arith.constant 0 : index
    %3 = vector.load %arg4[%c0, %c0_1, %c0_2] : memref<1x1x768xf32, #tpu.memory_space<vmem>>, vector<1x1x768xf32>
    %4 = vector.shape_cast %3 : vector<1x1x768xf32> to vector<1x768xf32>
    %c0_3 = arith.constant 0 : index
    %c0_4 = arith.constant 0 : index
    %c0_5 = arith.constant 0 : index
    %5 = vector.load %arg2[%c0_3, %c0_4, %c0_5] : memref<1x3x768xf32, #tpu.memory_space<vmem>>, vector<1x1x768xf32>
    %6 = vector.shape_cast %5 : vector<1x1x768xf32> to vector<1x768xf32>
    %c0_6 = arith.constant 0 : index
    %c0_7 = arith.constant 0 : index
    %c0_8 = arith.constant 0 : index
    %7 = vector.load %arg3[%c0_6, %c0_7, %c0_8] : memref<1x3x768xf32, #tpu.memory_space<vmem>>, vector<1x1x768xf32>
    %8 = vector.shape_cast %7 : vector<1x1x768xf32> to vector<1x768xf32>
    %9 = arith.mulf %6, %8 : vector<1x768xf32>
    %c0_9 = arith.constant 0 : index
    %c1 = arith.constant 1 : index
    %c0_10 = arith.constant 0 : index
    %10 = vector.load %arg2[%c0_9, %c1, %c0_10] : memref<1x3x768xf32, #tpu.memory_space<vmem>>, vector<1x1x768xf32>
    %11 = vector.shape_cast %10 : vector<1x1x768xf32> to vector<1x768xf32>
    %c0_11 = arith.constant 0 : index
    %c1_12 = arith.constant 1 : index
    %c0_13 = arith.constant 0 : index
    %12 = vector.load %arg3[%c0_11, %c1_12, %c0_13] : memref<1x3x768xf32, #tpu.memory_space<vmem>>, vector<1x1x768xf32>
    %13 = vector.shape_cast %12 : vector<1x1x768xf32> to vector<1x768xf32>
    %14 = arith.mulf %11, %13 : vector<1x768xf32>
    %15 = arith.addf %9, %14 : vector<1x768xf32>
    %c0_14 = arith.constant 0 : index
    %c2 = arith.constant 2 : index
    %c0_15 = arith.constant 0 : index
    %16 = vector.load %arg2[%c0_14, %c2, %c0_15] : memref<1x3x768xf32, #tpu.memory_space<vmem>>, vector<1x1x768xf32>
    %17 = vector.shape_cast %16 : vector<1x1x768xf32> to vector<1x768xf32>
    %c0_16 = arith.constant 0 : index
    %c2_17 = arith.constant 2 : index
    %c0_18 = arith.constant 0 : index
    %18 = vector.load %arg3[%c0_16, %c2_17, %c0_18] : memref<1x3x768xf32, #tpu.memory_space<vmem>>, vector<1x1x768xf32>
    %19 = vector.shape_cast %18 : vector<1x1x768xf32> to vector<1x768xf32>
    %20 = arith.mulf %17, %19 : vector<1x768xf32>
    %21 = arith.addf %15, %20 : vector<1x768xf32>
    %c0_19 = arith.constant 0 : index
    %22 = memref.load %arg6[%c0_19] : memref<2xf32, #tpu.memory_space<smem>>
    %cst = arith.constant 1.000000e+00 : f32
    %23 = vector.broadcast %cst : f32 to vector<1x768xf32>
    %24 = arith.subf %23, %21 : vector<1x768xf32>
    %25 = math.absf %24 : vector<1x768xf32>
    %26 = arith.mulf %25, %4 : vector<1x768xf32>
    %27 = vector.shape_cast %26 : vector<1x768xf32> to vector<1x1x768xf32>
    %cst_20 = arith.constant dense<0.000000e+00> : vector<1xf32>
    %28 = vector.multi_reduction <add>, %27, %cst_20 [1, 2] : vector<1x1x768xf32> to vector<1xf32>
    %29 = vector.shape_cast %28 : vector<1xf32> to vector<1x1x1xf32>
    %30 = vector.extract %29[0, 0, 0] : f32 from vector<1x1x1xf32>
    %31 = arith.addf %22, %30 : f32
    %c0_21 = arith.constant 0 : index
    %32 = memref.load %arg6[%c0_21] : memref<2xf32, #tpu.memory_space<smem>>
    memref.store %31, %arg6[%c0_21] : memref<2xf32, #tpu.memory_space<smem>>
    %c1_22 = arith.constant 1 : index
    %33 = memref.load %arg6[%c1_22] : memref<2xf32, #tpu.memory_space<smem>>
    %34 = vector.shape_cast %4 : vector<1x768xf32> to vector<1x1x768xf32>
    %cst_23 = arith.constant dense<0.000000e+00> : vector<1xf32>
    %35 = vector.multi_reduction <add>, %34, %cst_23 [1, 2] : vector<1x1x768xf32> to vector<1xf32>
    %36 = vector.shape_cast %35 : vector<1xf32> to vector<1x1x1xf32>
    %37 = vector.extract %36[0, 0, 0] : f32 from vector<1x1x1xf32>
    %38 = arith.addf %33, %37 : f32
    %c1_24 = arith.constant 1 : index
    %39 = memref.load %arg6[%c1_24] : memref<2xf32, #tpu.memory_space<smem>>
    memref.store %38, %arg6[%c1_24] : memref<2xf32, #tpu.memory_space<smem>>
    %c0_i32_25 = arith.constant 0 : i32
    %40 = arith.cmpi eq, %arg1, %c0_i32_25 : i32
    %41 = arith.extui %40 : i1 to i32
    %c0_i32_26 = arith.constant 0 : i32
    %42 = arith.cmpi ne, %41, %c0_i32_26 : i32
    scf.if %42 {
      %43 = tpu.iota {dimensions = array<i32: 0>} : vector<8x128xi32>
      %c0_i32_27 = arith.constant 0 : i32
      %44 = vector.broadcast %c0_i32_27 : i32 to vector<8x128xi32>
      %45 = arith.cmpi eq, %43, %44 : vector<8x128xi32>
      %c0_28 = arith.constant 0 : index
      %46 = memref.load %arg6[%c0_28] : memref<2xf32, #tpu.memory_space<smem>>
      %c1_i32 = arith.constant 1 : i32
      %47 = vector.broadcast %c1_i32 : i32 to vector<8x128xi32>
      %48 = arith.cmpi eq, %43, %47 : vector<8x128xi32>
      %c1_29 = arith.constant 1 : index
      %49 = memref.load %arg6[%c1_29] : memref<2xf32, #tpu.memory_space<smem>>
      %cst_30 = arith.constant 0.000000e+00 : f32
      %50 = vector.broadcast %49 : f32 to vector<8x128xf32>
      %51 = vector.broadcast %cst_30 : f32 to vector<8x128xf32>
      %52 = arith.select %48, %50, %51 : vector<8x128xi1>, vector<8x128xf32>
      %53 = vector.broadcast %46 : f32 to vector<8x128xf32>
      %54 = arith.select %45, %53, %52 : vector<8x128xi1>, vector<8x128xf32>
      %c0_31 = arith.constant 0 : index
      %c0_32 = arith.constant 0 : index
      %c0_33 = arith.constant 0 : index
      %55 = vector.load %arg5[%c0_31, %c0_32, %c0_33] : memref<1x8x128xf32, #tpu.memory_space<vmem>>, vector<1x8x128xf32>
      %56 = vector.shape_cast %55 : vector<1x8x128xf32> to vector<8x128xf32>
      %57 = vector.shape_cast %54 : vector<8x128xf32> to vector<1x8x128xf32>
      tpu.vector_store %arg5[%c0_31, %c0_32, %c0_33], %57 {strides = array<i32>} : memref<1x8x128xf32, #tpu.memory_space<vmem>>, vector<1x8x128xf32>,
    } else {
    }
    return
  }
  func.func @transform_0(%arg0: i32, %arg1: i32) -> (i32, i32, i32) {
    %c0_i32 = arith.constant 0 : i32
    %c0_i32_0 = arith.constant 0 : i32
    return %arg0, %c0_i32, %arg1 : i32, i32, i32
  }
  func.func @transform_1(%arg0: i32, %arg1: i32) -> (i32, i32, i32) {
    %c0_i32 = arith.constant 0 : i32
    %c0_i32_0 = arith.constant 0 : i32
    return %arg0, %c0_i32, %arg1 : i32, i32, i32
  }
  func.func @transform_2(%arg0: i32, %arg1: i32) -> (i32, i32, i32) {
    %c0_i32 = arith.constant 0 : i32
    %c0_i32_0 = arith.constant 0 : i32
    return %arg0, %c0_i32, %arg1 : i32, i32, i32
  }
  func.func @transform_3(%arg0: i32, %arg1: i32) -> (i32, i32, i32) {
    %c0_i32 = arith.constant 0 : i32
    %c0_i32_0 = arith.constant 0 : i32
    %c0_i32_1 = arith.constant 0 : i32
    return %arg0, %c0_i32, %c0_i32_0 : i32, i32, i32
  }
}

</mosaic_0001>

<bundles_post_ra>
// kernel: run.2
= control target key start
LH: loop header
LB: loop body
LE: loop exit
PB: predicated region body
PF: predicated region fallthrough
CT: control target
= control target key end

     0   :  { %s469_s9 = smov 0   ;;  %s550_s0 = inlined_call_operand.vmem [shape: f32[2,16,16], index: 0, kind: input, shape index: {}]   ;;  %s551_s1 = inlined_call_operand.vmem [shape: f32[2,16,16], index: 1, kind: output, shape index: {0}]   ;;  %s552_s2 = inlined_call_operand.vmem [shape: f32[2,16,16], index: 2, kind: output, shape index: {1}]  }
   0x1 LB: > { %s402_s10 = sadd.s32 4294967295, %s446_s9   ;;  %p406_p0 = scmp.ge.s32.totalorder %s446_s9, 1  ;;  %s446_s9 = sphi %s469_s9, %s13_s9  }
   0x2   : > { %p115_p1 = scmp.lt.s32.totalorder %s446_s9, 3 }
   0x4   : > { %p116_p2 = pnand %p406_p0, %p115_p1 }
   0x5   : > { %p142_p3 = scmp.lt.s32.totalorder (!%p116_p2), %s402_s10, 1  ;;  %v161_v0 = vlaneseq (!%p116_p2)  ;;  %s448_s15 = smov (!%p116_p2), 16   ;;  %vm177_vm2 = vcmask (!%p116_p2), 1047680   ;;  %vm301_vm11 = vcmask (!%p116_p2), 130048  }
   0x6   : > { %119 = sbr.rel (%p116_p2) target bundleno = 529 (0x211), region = 24  ;;  %s449_s16 = smov (!%p116_p2), 15  }
   0x7   : > { %v478_v1 = vshrl.u32 (!%p116_p2), %v161_v0, 7  ;;  %s450_s17 = smov (!%p116_p2), 14   ;;  %s451_s18 = smov (!%p116_p2), 114   ;;  %v252_v46 = vand.u32 (!%p116_p2), 127, %v161_v0 }
   0x8   : > { %s452_s19 = smov (!%p116_p2), 113   ;;  %s453_s20 = smov (!%p116_p2), 127  }
   0x9   : > { %vm163_vm0 = vcmp.lt.s32.totalorder (!%p116_p2), %v478_v1, 1  ;;  %vm172_vm1 = vcmp.lt.s32.totalorder (!%p116_p2), %v478_v1, 7  ;;  %vm253_vm3 = vcmp.ge.s32.totalorder (!%p116_p2), %v478_v1, 1  ;;  %vm259_vm4 = vcmp.ge.s32.totalorder (!%p116_p2), %v252_v46, 1 }
   0xa   : > { %v250_v47 = vadd.s32 (!%p116_p2), 8, %v478_v1  ;;  %vm260_vm5 = vmand (!%p116_p2), %vm253_vm3, %vm259_vm4  ;;  %vm262_vm6 = vcmp.le.s32.totalorder (!%p116_p2), %v252_v46, 14 }
   0xb   : > { %vm516_vm8 = vmand (!%p116_p2), %vm260_vm5, %vm262_vm6 }
   0xc   : > { %vm256_vm7 = vcmp.le.s32.totalorder (!%p116_p2), %v250_v47, 14 }
   0xd   : > { %s556_s10 = smov (!%p142_p3, %s402_s10), 1  ;;  %vm261_vm9 = vmand %vm256_vm7, %vm259_vm4 }
   0xe   : > { %s480_s11 = sshll.u32 %s556_s10, 4  ;;  %vm264_vm10 = vmand %vm261_vm9, %vm262_vm6 }
   0xf   : > { %s146_s14 = scalar_lea.vmem %s550_s0, %s480_s11  ;;  %s151_s23 = scalar_lea.vmem %s551_s1, %s480_s11 }
  0x10   : > { %v157_v2 = vld [vmem:[%s146_s14] sm:$0xff]  ;;  %v158_v3 = vld [vmem:[%s146_s14 + $0x8] sm:$0xff]  ;;  %s156_s26 = scalar_lea.vmem %s552_s2, %s480_s11 }
  0x11   : > { %178 = vrot.lane.b32.xlu0 %v157_v2, %s448_s15  ;;  %v159_v4 = vrot.slane %v157_v2, 7  ;;  %v160_v5 = vrot.slane %v158_v3, 7  ;;  %v166_v6 = vmul.f32 2.0, %v157_v2  ;;  %v170_v7 = vrot.slane %v157_v2, 1 }
  0x12   : > { %v171_v8 = vrot.slane %v158_v3, 1  ;;  %v167_v9 = vmul.f32 2.0, %v158_v3 }
  0x13   : > { %v165_v10 = vsel %vm163_vm0, %v160_v5, %v159_v4  ;;  %v164_v11 = vsel %vm163_vm0, %v159_v4, %v160_v5 }
  0x14   : > { %v168_v12 = vadd.f32 %v166_v6, %v165_v10  ;;  %v173_v13 = vsel %vm172_vm1, %v170_v7, %v171_v8  ;;  %v169_v14 = vadd.f32 %v167_v9, %v164_v11  ;;  %v174_v15 = vsel %vm172_vm1, %v171_v8, %v170_v7 }
  0x15   : > { %181 = vrot.lane.b32.xlu0 %v158_v3, %s448_s15 }
  0x16   : > { %v175_v16 = vadd.f32 %v173_v13, %v168_v12  ;;  %v176_v17 = vadd.f32 %v174_v15, %v169_v14 }
  0x18   : > { %210 = vrot.lane.b32.xlu1 %v175_v16, %s448_s15 }
  0x1c   : > { %213 = vrot.lane.b32.xlu1 %v176_v17, %s448_s15 }
  0x83   : > { %v179_v18 = vpop.permute.xlu0 %178 }
  0x84   : > { %v180_v19 = vsel %vm177_vm2, %v179_v18, %v157_v2 }
  0x85   : > { %184 = vrot.lane.b32.xlu0 %v180_v19, %s448_s15 }
  0x87   : > { %v182_v20 = vpop.permute.xlu0 %181 }
  0x88   : > { %v183_v21 = vsel %vm177_vm2, %v182_v20, %v158_v3 }
  0x89   : > { %186 = vrot.lane.b32.xlu1 %v183_v21, %s448_s15 }
  0x8a   : > { %v211_v22 = vpop.permute.xlu1 %210 }
  0x8b   : > { %v212_v23 = vsel %vm177_vm2, %v211_v22, %v175_v16 }
  0x8c   : > { %216 = vrot.lane.b32.xlu0 %v212_v23, %s448_s15 }
  0x8e   : > { %v214_v24 = vpop.permute.xlu1 %213 }
  0x8f   : > { %v215_v25 = vsel %vm177_vm2, %v214_v24, %v176_v17 }
  0x90   : > { %192 = vrot.lane.b32.xlu0 %v166_v6, %s449_s16  ;;  %218 = vrot.lane.b32.xlu1 %v215_v25, %s448_s15 }
  0x94   : > { %194 = vrot.lane.b32.xlu1 %v167_v9, %s449_s16 }
  0xf7   : > { %v185_v26 = vpop.permute.xlu0 %184 }
  0xf8   : > { %v188_v27 = vsel %vm177_vm2, %v185_v26, %v157_v2 }
  0xf9   : > { %202 = vrot.lane.b32.xlu0 %v188_v27, %s450_s17 }
  0xfb   : > { %v187_v28 = vpop.permute.xlu1 %186 }
  0xfc   : > { %v189_v29 = vsel %vm177_vm2, %v187_v28, %v158_v3 }
  0xfd   : > { %204 = vrot.lane.b32.xlu1 %v189_v29, %s450_s17 }
  0xfe   : > { %v217_v30 = vpop.permute.xlu0 %216 }
  0xff   : > { %v220_v31 = vsel %vm177_vm2, %v217_v30, %v175_v16 }
 0x100   : > { %224 = vrot.lane.b32.xlu0 %v220_v31, %s451_s18 }
 0x102   : > { %v219_v32 = vpop.permute.xlu1 %218  ;;  %v193_v34 = vpop.permute.xlu0 %192 }
 0x103   : > { %v221_v33 = vsel %vm177_vm2, %v219_v32, %v176_v17  ;;  %v198_v35 = vadd.f32 %v193_v34, %v188_v27 }
 0x104   : > { %226 = vrot.lane.b32.xlu1 %v221_v33, %s451_s18 }
 0x106   : > { %v195_v36 = vpop.permute.xlu1 %194 }
 0x107   : > { %v199_v39 = vadd.f32 %v195_v36, %v189_v29 }
 0x16b   : > { %v203_v37 = vpop.permute.xlu0 %202 }
 0x16c   : > { %v208_v38 = vadd.f32 %v203_v37, %v198_v35 }
 0x16e   : > { %234 = vrot.lane.b32.xlu0 %v208_v38, %s452_s19 }
 0x16f   : > { %v205_v40 = vpop.permute.xlu1 %204 }
 0x170   : > { %v209_v41 = vadd.f32 %v205_v40, %v199_v39 }
 0x172   : > { %v225_v42 = vpop.permute.xlu0 %224  ;;  %236 = vrot.lane.b32.xlu1 %v209_v41, %s452_s19 }
 0x173   : > { %v230_v43 = vsub.f32 %v220_v31, %v225_v42 }
 0x175   : > { %267 = vrot.lane.b32.xlu0 %v230_v43, %s453_s20 }
 0x176   : > { %v227_v44 = vpop.permute.xlu1 %226 }
 0x177   : > { %v231_v45 = vsub.f32 %v221_v33, %v227_v44 }
 0x179   : > { %269 = vrot.lane.b32.xlu1 %v231_v45, %s453_s20 }
 0x1e0   : > { %v235_v48 = vpop.permute.xlu0 %234 }
 0x1e1   : > { %v240_v51 = vrot.slane %v235_v48, 7  ;;  %v244_v52 = vrot.slane %v235_v48, 1 }
 0x1e4   : > { %v237_v49 = vpop.permute.xlu1 %236 }
 0x1e5   : > { %v241_v53 = vrot.slane %v237_v49, 7  ;;  %v245_v54 = vrot.slane %v237_v49, 1 }
 0x1e7   : > { %v268_v55 = vpop.permute.xlu0 %267  ;;  %v243_v56 = vsel %vm163_vm0, %v241_v53, %v240_v51  ;;  %v246_v57 = vsel %vm172_vm1, %v244_v52, %v245_v54  ;;  %v242_v58 = vsel %vm163_vm0, %v240_v51, %v241_v53  ;;  %v247_v59 = vsel %vm172_vm1, %v245_v54, %v244_v52 }
 0x1e8   : > { %v248_v60 = vsub.f32 %v243_v56, %v246_v57  ;;  %v273_v61 = vsel %vm516_vm8, %v268_v55, 0.0  ;;  %v249_v62 = vsub.f32 %v242_v58, %v247_v59 }
 0x1e9   : > { %v277_v0 = vmul.f32 %v273_v61, %v273_v61  ;;  %v304_v21 = vand.u32 2147483647, %v273_v61 }
 0x1ea   : > { %v275_v63 = vsel %vm516_vm8, %v248_v60, 0.0  ;;  %v276_v3 = vsel %vm264_vm10, %v249_v62, 0.0 }
 0x1eb   : > { %v279_v2 = vmul.f32 %v275_v63, %v275_v63  ;;  %v270_v4 = vpop.permute.xlu1 %269  ;;  %v280_v1 = vmul.f32 %v276_v3, %v276_v3 }
 0x1ec   : > { %v274_v5 = vsel %vm264_vm10, %v270_v4, 0.0 }
 0x1ed   : > { %v281_v6 = vadd.f32 %v279_v2, %v277_v0  ;;  %v278_v7 = vmul.f32 %v274_v5, %v274_v5  ;;  %v305_v24 = vand.u32 2147483647, %v274_v5 }
 0x1ef   : > { %432 = vrsqrt.f32 %v281_v6  ;;  %v282_v8 = vadd.f32 %v280_v1, %v278_v7  ;;  %vm285_vm12 = vcmp.eq.f32.partialorder %v281_v6, inf  ;;  %v288_v11 = vand.u32 2147483648, %v281_v6 }
 0x1f0   : > { %vm287_vm13 = vcmp.eq.f32.partialorder %v281_v6, 0.0 }
 0x1f1   : > { %434 = vrsqrt.f32 %v282_v8  ;;  %vm292_vm15 = vcmp.eq.f32.partialorder %v282_v8, inf  ;;  %v295_v16 = vand.u32 2147483648, %v282_v8  ;;  %vm294_vm0 = vcmp.eq.f32.partialorder %v282_v8, 0.0 }
 0x1f9   : > { %v433_v9 = vpop.eup %432 }
 0x1fa   : > { %v284_v10 = vmul.f32 %v433_v9, %v281_v6 }
 0x1fb   : > { %v435_v12 = vpop.eup %434 }
 0x1fc   : > { %v286_v13 = vsel %vm285_vm12, %v281_v6, %v284_v10  ;;  %v291_v15 = vmul.f32 %v435_v12, %v282_v8 }
 0x1fd   : > { %v289_v14 = vsel %vm287_vm13, %v288_v11, %v286_v13 }
 0x1fe   : > { %vm297_vm14 = vcmp.gt.f32.partialorder %v289_v14, 0.0  ;;  %302 = vst.msk [vmem:[%s151_s23] sm:$0xff] %vm301_vm11, %v289_v14  ;;  %v293_v18 = vsel %vm292_vm15, %v282_v8, %v291_v15 }
 0x1ff   : > { %v299_v17 = vsel %vm297_vm14, %v289_v14, 1.0  ;;  %v296_v19 = vsel %vm294_vm0, %v295_v16, %v293_v18 }
 0x200   : > { %436 = vrcp.f32 %v299_v17  ;;  %vm298_vm1 = vcmp.gt.f32.partialorder %v296_v19, 0.0  ;;  %303 = vst.msk [vmem:[%s151_s23 + $0x8] sm:$0xff] %vm301_vm11, %v296_v19 }
 0x201   : > { %v300_v20 = vsel %vm298_vm1, %v296_v19, 1.0 }
 0x202   : > { %438 = vrcp.f32 %v300_v20 }
 0x20a   : > { %v437_v22 = vpop.eup %436 }
 0x20b   : > { %v307_v23 = vmul.f32 %v437_v22, %v304_v21 }
 0x20c   : > { %v439_v25 = vpop.eup %438 }
 0x20d   : > { %v310_v26 = vsel %vm297_vm14, %v307_v23, 1.0  ;;  %v309_v27 = vmul.f32 %v439_v25, %v305_v24 }
 0x20e   : > { %312 = vst.msk [vmem:[%s156_s26] sm:$0xff] %vm301_vm11, %v310_v26 }
 0x20f   : > { %v311_v28 = vsel %vm298_vm1, %v309_v27, 1.0 }
 0x210   : > { %313 = vst.msk [vmem:[%s156_s26 + $0x8] sm:$0xff] %vm301_vm11, %v311_v28 }
 0x211 PF: > { %s13_s9 = sadd.s32 1, %s446_s9  }
 0x212   : > { %p10_p4 = scmp.ge.s32.totalorder %s13_s9, 4  }
 0x214   :  { %12 = sbr.rel (!%p10_p4) target bundleno = 1 (0x1), region = 66 }

// kernel: run.3
= control target key start
LH: loop header
LB: loop body
LE: loop exit
PB: predicated region body
PF: predicated region fallthrough
CT: control target
= control target key end

     0   :  { %s608_s12 = smov 0   ;;  %s610_s13 = smov 0   ;;  %s674_s0 = inlined_call_operand.vmem [shape: f32[2,3,768], index: 0, kind: input, shape index: {}]   ;;  %s675_s1 = inlined_call_operand.vmem [shape: f32[2,3,768], index: 1, kind: input, shape index: {}]   ;;  %s676_s2 = inlined_call_operand.vmem [shape: f32[2,1,768], index: 2, kind: input, shape index: {}]   ;;  %s677_s3 = inlined_call_operand.vmem [shape: f32[2,8,128], index: 3, kind: output, shape index: {}]  }
   0x1   :  { %s612_s14 = smov 0  }
   0x2 LB: > { %s25_s15 = sadd.s32 1, %s582_s13  ;;  %p522_p0 = scmp.ge.s32.totalorder %s586_s14, 1  ;;  %s586_s14 = sphi %s612_s14, %s13_s14   ;;  %s582_s13 = sphi %s610_s13, %s679_s13   ;;  %s578_s12 = sphi %s608_s12, %s678_s12  }
   0x3   : > { %p27_p1 = scmp.ge.s32.totalorder %s25_s15, 2  ;;  %p189_p2 = scmp.lt.s32.totalorder %s586_s14, 3 }
   0x5   : > { %s681_s15 = smov (%p27_p1, %s25_s15), 0  ;;  %p190_p3 = pnand %p522_p0, %p189_p2 }
   0x6   : > { %p234_p4 = scmp.lt.s32.totalorder (!%p190_p3), %s578_s12, 1  ;;  %v295_v0 = vlaneseq (!%p190_p3)  ;;  %vm325_vm0 = vcmask (!%p190_p3), 1040384  }
   0x7   : > { %193 = sbr.rel (%p190_p3) target bundleno = 257 (0x101), region = 32 }
   0x8   : > { %v636_v1 = vshrl.u32 (!%p190_p3), %v295_v0, 7 }
   0xa   : > { %v297_v10 = vsub.s32 (!%p190_p3), 0, %v636_v1  ;;  %v301_v11 = vsub.s32 (!%p190_p3), 1, %v636_v1  ;;  %v305_v18 = vsub.s32 (!%p190_p3), 2, %v636_v1  ;;  %v309_v23 = vsub.s32 (!%p190_p3), 3, %v636_v1 }
   0xb   : > { %v313_v28 = vsub.s32 (!%p190_p3), 4, %v636_v1  ;;  %v317_v30 = vsub.s32 (!%p190_p3), 5, %v636_v1  ;;  %vm411_vm1 = vcmp.eq.s32.totalorder (!%p190_p3), %v636_v1, 1  ;;  %vm409_vm2 = vcmp.eq.s32.totalorder (!%p190_p3), %v636_v1, 0 }
   0xe   : > { %s683_s12 = smov (!%p234_p4, %s578_s12), 1 }
   0xf   : > { %s534_s16 = smul.u32 24, %s683_s12  ;;  %s525_s27 = sshll.u32 %s683_s12, 3 }
  0x10   : > { %s535_s17 = smul.u32 6, %s683_s12  ;;  %s265_s5 = scalar_lea.vmem %s677_s3, %s525_s27 }
  0x11   : > { %s241_s20 = scalar_lea.vmem %s674_s0, %s534_s16  ;;  %s251_s23 = scalar_lea.vmem %s675_s1, %s534_s16 }
  0x12   : > { %v275_v2 = vld [vmem:[%s241_s20] ss:$4 sm:$0x3f]  ;;  %s260_s26 = scalar_lea.vmem %s676_s2, %s535_s17  ;;  %v526_v5 = vld [vmem:[%s241_s20 + $0x1] ss:$4 sm:$0x3f] }
  0x13   : > { %v276_v3 = vld [vmem:[%s251_s23] ss:$4 sm:$0x3f]  ;;  %v527_v6 = vld [vmem:[%s251_s23 + $0x1] ss:$4 sm:$0x3f] }
  0x14   : > { %v277_v4 = vmul.f32 %v276_v3, %v275_v2  ;;  %v528_v7 = vld [vmem:[%s241_s20 + $0x2] ss:$4 sm:$0x3f]  ;;  %v282_v8 = vmul.f32 %v527_v6, %v526_v5 }
  0x15   : > { %v529_v9 = vld [vmem:[%s251_s23 + $0x2] ss:$4 sm:$0x3f] }
  0x16   : > { %v274_v12 = vld [vmem:[%s260_s26] sm:$0x3f]  ;;  %v288_v13 = vmul.f32 %v529_v9, %v528_v7  ;;  %v283_v14 = vadd.f32 %v282_v8, %v277_v4 }
  0x17   : > { %v354_v15 = vrot.slane %v274_v12, %v297_v10  ;;  %v358_v16 = vrot.slane %v274_v12, %v301_v11  ;;  %v362_v20 = vrot.slane %v274_v12, %v305_v18  ;;  %v366_v25 = vrot.slane %v274_v12, %v309_v23 }
  0x18   : > { %v289_v17 = vadd.f32 %v288_v13, %v283_v14  ;;  %v370_v35 = vrot.slane %v274_v12, %v313_v28  ;;  %v374_v48 = vrot.slane %v274_v12, %v317_v30 }
  0x19   : > { %v381_v21 = vsel %vm325_vm0, %v354_v15, 0.0  ;;  %v382_v22 = vsel %vm325_vm0, %v358_v16, 0.0  ;;  %v384_v29 = vsel %vm325_vm0, %v362_v20, 0.0  ;;  %v386_v37 = vsel %vm325_vm0, %v366_v25, 0.0 }
  0x1a   : > { %v291_v19 = vsub.f32 1.0, %v289_v17  ;;  %v383_v26 = vadd.f32 %v382_v22, %v381_v21  ;;  %v388_v49 = vsel %vm325_vm0, %v370_v35, 0.0  ;;  %v390_v54 = vsel %vm325_vm0, %v374_v48, 0.0 }
  0x1c   : > { %v292_v24 = vand.u32 2147483647, %v291_v19  ;;  %v385_v36 = vadd.f32 %v384_v29, %v383_v26 }
  0x1e   : > { %v293_v27 = vmul.f32 %v292_v24, %v274_v12  ;;  %v387_v46 = vadd.f32 %v386_v37, %v385_v36 }
  0x20   : > { %v298_v31 = vrot.slane %v293_v27, %v297_v10  ;;  %v302_v32 = vrot.slane %v293_v27, %v301_v11  ;;  %v306_v33 = vrot.slane %v293_v27, %v305_v18  ;;  %v310_v34 = vrot.slane %v293_v27, %v309_v23 }
  0x21   : > { %v314_v38 = vrot.slane %v293_v27, %v313_v28  ;;  %v318_v43 = vrot.slane %v293_v27, %v317_v30  ;;  %v389_v53 = vadd.f32 %v388_v49, %v387_v46 }
  0x22   : > { %v326_v39 = vsel %vm325_vm0, %v298_v31, 0.0  ;;  %v327_v40 = vsel %vm325_vm0, %v302_v32, 0.0  ;;  %v329_v41 = vsel %vm325_vm0, %v306_v33, 0.0  ;;  %v331_v44 = vsel %vm325_vm0, %v310_v34, 0.0 }
  0x23   : > { %v328_v42 = vadd.f32 %v327_v40, %v326_v39  ;;  %v333_v47 = vsel %vm325_vm0, %v314_v38, 0.0  ;;  %v335_v51 = vsel %vm325_vm0, %v318_v43, 0.0  ;;  %v391_v56 = vadd.f32 %v390_v54, %v389_v53 }
  0x25   : > { %v330_v45 = vadd.f32 %v329_v41, %v328_v42 }
  0x27   : > { %v332_v50 = vadd.f32 %v331_v44, %v330_v45 }
  0x29   : > { %v334_v52 = vadd.f32 %v333_v47, %v332_v50 }
  0x2b   : > { %v336_v55 = vadd.f32 %v335_v51, %v334_v52 }
  0x2d   : > { %337 = vadd.xlane.f32.xlu0 %v336_v55 }
  0x31   : > { %392 = vadd.xlane.f32.xlu0 %v391_v56 }
  0xba   : > { %v338_v57 = vpop.xlane.xlu0 %337 }
  0xbb   : > { %v339_v58 = vrot.slane %v338_v57, 4 }
  0xbd   : > { %v340_v59 = vadd.f32 %v339_v58, %v338_v57 }
  0xbe   : > { %v393_v60 = vpop.xlane.xlu0 %392 }
  0xbf   : > { %v341_v61 = vrot.slane %v340_v59, 2  ;;  %v394_v62 = vrot.slane %v393_v60, 4 }
  0xc1   : > { %v395_v63 = vadd.f32 %v394_v62, %v393_v60  ;;  %v342_v0 = vadd.f32 %v341_v61, %v340_v59 }
  0xc3   : > { %v396_v2 = vrot.slane %v395_v63, 2  ;;  %v343_v3 = vrot.slane %v342_v0, 1 }
  0xc5   : > { %v397_v4 = vadd.f32 %v396_v2, %v395_v63  ;;  %v344_v5 = vadd.f32 %v343_v3, %v342_v0 }
  0xc7   : > { %536 = vpush %v344_v5  ;;  %v398_v6 = vrot.slane %v397_v4, 1 }
  0xc9   : > { %v399_v7 = vadd.f32 %v398_v6, %v397_v4 }
  0xcb   : > { %538 = vpush %v399_v7 }
  0xf8   : > { %s537_s28 = spop %536 }
  0xf9   : > { %v415_v9 = vstv %s537_s28 }
  0xfc   : > { %s539_s29 = spop %538 }
  0xfd   : > { %v413_v8 = vstv %s539_s29 }
  0xfe   : > { %v414_v10 = vsel %vm411_vm1, %v413_v8, 0.0 }
  0xff   : > { %v416_v11 = vsel %vm409_vm2, %v415_v9, %v414_v10 }
 0x100   : > { %417 = vst [vmem:[%s265_s5] sm:$0xff] %v416_v11 }
 0x101 PF: > { %s13_s14 = sadd.s32 1, %s586_s14   ;;  %s678_s12 = smov %s582_s13 }
 0x102   : > { %p10_p5 = scmp.ge.s32.totalorder %s13_s14, 4   ;;  %s679_s13 = smov %s681_s15 }
 0x104   :  { %12 = sbr.rel (!%p10_p5) target bundleno = 2 (0x2), region = 84 }

</bundles_post_ra>
